<compile_context>
chip_gen: v7x
topology: tpu7x:2x2x1
jax: 0.10.0
libtpu: 0.0.40
codegen_flags: <defaults>
</compile_context>

<pallas_src>
import functools

import jax
import jax.numpy as jnp
from jax import lax
from jax.experimental import pallas as pl
from jax.experimental.pallas import tpu as pltpu


def _default_tile():
    """256 for v6e/v7x (2x256x256 MXU), 128 for v4/v5e/v5p (128x128 MXU)."""
    try:
        kind = jax.devices()[0].device_kind.lower()
    except Exception:
        return 128
    if "v6" in kind or "v7" in kind:
        return 256
    return 128


# ---------------------------------------------------------------------------
# fast path: single grid-less invocation (small T), exact f32
# ---------------------------------------------------------------------------
def _small_kernel(w_ref, x_ref, out_ref, *, t, n_col):
    x = x_ref[...]                                   # (t, n_pad) f32
    w = w_ref[...]                                   # (1, t)     f32

    k_idx = lax.broadcasted_iota(jnp.int32, (t, t), 0)
    i_idx = lax.broadcasted_iota(jnp.int32, (t, t), 1)
    dist = (k_idx - i_idx).astype(jnp.float32)
    # inverse_sigmoid(d) = 1 / (1 + exp(-0.7 * (31 - d - 20)))
    dw = 1.0 / (1.0 + jnp.exp(-0.7 * (11.0 - dist)))
    W = jnp.where(i_idx < k_idx, dw * w, 0.0)        # (t, t)

    # One MXU matmul gives the weighted sums AND (ones column) the denominator.
    num = jnp.dot(W, x, preferred_element_type=jnp.float32)   # (t, n_pad)
    denom = num[:, n_col:n_col + 1]                  # ones column -> row sums
    pred = num / jnp.where(denom == 0.0, 1.0, denom)  # guard row k=0 only
    diff = pred - x                                  # padded & ones cols -> 0

    valid = (lax.broadcasted_iota(jnp.int32, (t, 1), 0) >= 1).astype(jnp.float32)
    per_row = jnp.sum(diff * diff, axis=1, keepdims=True) * valid
    total = jnp.sum(per_row) / jnp.float32(t - 1)
    out_ref[...] = jnp.broadcast_to(total, out_ref.shape)     # lane-dense (1,128)


def _small_loss(weights, x):
    T, N = x.shape
    n_pad = max(128, pl.cdiv(N + 1, 128) * 128)
    xf = x.astype(jnp.float32)
    x_aug = jnp.zeros((T, n_pad), jnp.float32)
    x_aug = x_aug.at[:, :N].set(xf)
    x_aug = x_aug.at[:, N].set(1.0)                  # ones column -> row sums
    w_pad = weights.astype(jnp.float32).reshape(1, T)

    out = pl.pallas_call(
        functools.partial(_small_kernel, t=T, n_col=N),
        out_shape=jax.ShapeDtypeStruct((1, 128), jnp.float32),
        in_specs=[
            pl.BlockSpec((1, T), lambda: (0, 0)),
            pl.BlockSpec((T, n_pad), lambda: (0, 0)),
        ],
        out_specs=pl.BlockSpec((1, 128), lambda: (0, 0)),
    )(w_pad, x_aug)
    return out[0, 0]


# ---------------------------------------------------------------------------
# tiled path: banded grid (k row tiles, band slots), f32 VMEM accumulator
# ---------------------------------------------------------------------------
def _tiled_kernel(dw_ref, xh_ref, xt_ref, out_ref, acc_ref, *,
                  t_real, n_col, tile, n_band):
    kt = pl.program_id(0)          # prediction-row tile   ("parallel")
    j = pl.program_id(1)           # band / reduction slot  ("arbitrary", last)

    @pl.when(j == 0)
    def _init():
        acc_ref[...] = jnp.zeros_like(acc_ref)

    # History tile requested for this band slot (pre-clamp).  Negative means
    # the slot falls before the start of the sequence; its DMA index was
    # clamped to 0, so guard here to avoid accumulating tile 0 twice (kt == 0).
    live = (kt - (n_band - 1) + j) >= 0

    @pl.when(live)
    def _accumulate():
        # dw_ref[j] is the precomputed, pre-masked Toeplitz dw tile for
        # diagonal offset (n_band - 1 - j); pure bf16 MXU matmul, f32 acc.
        acc_ref[...] += jnp.dot(dw_ref[j], xh_ref[...],
                                preferred_element_type=jnp.float32)

    @pl.when(j == n_band - 1)
    def _finalize():
        acc = acc_ref[...]                                   # (tile, n_pad) f32
        denom = acc[:, n_col:n_col + 1]                      # weights column
        safe = jnp.where(denom == 0.0, 1.0, denom)           # guard k == 0 rows
        pred = acc * pl.reciprocal(safe, approx=True)        # EUP, not VPU div
        diff = pred - xt_ref[...]                            # extra cols -> ~0
        gk = kt * tile + lax.broadcasted_iota(jnp.int32, (tile, 1), 0)
        valid = jnp.logical_and(gk >= 1, gk < t_real).astype(jnp.float32)
        per_row = jnp.sum(diff * diff, axis=1, keepdims=True) * valid
        out_ref[...] = jnp.broadcast_to(jnp.sum(per_row), out_ref.shape)


def _tiled_loss(weights, x, *, tile=128, mxu_dtype=jnp.bfloat16, band=64):
    T, N = x.shape
    # TODO(synk): T == 1 divides by (T - 1) == 0, matching the PyTorch module.
    band = max(int(band), 48)        # dw ~ exp(-0.7*(d-11)) is ~0 beyond ~40
    n_pad = max(128, pl.cdiv(N + 1, 128) * 128)
    t_pad = pl.cdiv(T, tile) * tile
    nk = t_pad // tile
    n_band = min(nk, pl.cdiv(band, tile) + 1)

    wf = weights.astype(jnp.float32)
    xf = x.astype(jnp.float32)

    # History operand: weights folded in; column N carries weights[i] so the
    # matmul's column N is the per-row denominator.  Pre-cast to bf16.
    xh = jnp.zeros((t_pad, n_pad), jnp.float32)
    xh = xh.at[:T, :N].set(xf * wf[:, None])
    xh = xh.at[:T, N].set(wf)
    xh = xh.astype(mxu_dtype)

    # Target operand (f32): plain x with a ones column (cancels in the diff).
    xt = jnp.zeros((t_pad, n_pad), jnp.float32)
    xt = xt.at[:T, :N].set(xf)
    xt = xt.at[:T, N].set(1.0)

    # Masked dw Toeplitz tiles, one per diagonal offset; band-grid index j
    # corresponds to offset (n_band - 1 - j).  (i < k) mask pre-applied.
    deltas = (n_band - 1 - jnp.arange(n_band, dtype=jnp.int32)) * tile
    a = jnp.arange(tile, dtype=jnp.int32)
    d = deltas[:, None, None] + a[None, :, None] - a[None, None, :]
    dwf = 1.0 / (1.0 + jnp.exp(-0.7 * (11.0 - d.astype(jnp.float32))))
    dw = jnp.where(d > 0, dwf, 0.0).astype(mxu_dtype)   # (n_band, tile, tile)

    kernel = functools.partial(
        _tiled_kernel, t_real=T, n_col=N, tile=tile, n_band=n_band)

    out = pl.pallas_call(
        kernel,
        out_shape=jax.ShapeDtypeStruct((nk, 8, 128), jnp.float32),
        grid_spec=pltpu.PrefetchScalarGridSpec(
            num_scalar_prefetch=0,
            grid=(nk, n_band),                       # reduction (band) axis last
            in_specs=[
                # dw tiles: constant index -> DMA'd once, stays VMEM-resident.
                pl.BlockSpec((n_band, tile, tile), lambda kt, j: (0, 0, 0)),
                # history x (bf16, weights folded): banded, clamped to block 0.
                pl.BlockSpec(
                    (tile, n_pad),
                    lambda kt, j: (jnp.maximum(kt - (n_band - 1) + j, 0), 0)),
                # target x (f32).
                pl.BlockSpec((tile, n_pad), lambda kt, j: (kt, 0)),
            ],
            out_specs=pl.BlockSpec((1, 8, 128), lambda kt, j: (kt, 0, 0)),
            scratch_shapes=[pltpu.VMEM((tile, n_pad), jnp.float32)],  # f32 acc
        ),
        compiler_params=pltpu.CompilerParams(
            dimension_semantics=("parallel", "arbitrary")),
    )(dw, xh, xt)

    return jnp.sum(out[:, 0, 0]) / jnp.float32(T - 1)


# ---------------------------------------------------------------------------
# public entry point
# ---------------------------------------------------------------------------
def weight_optimizer_loss(weights, x, *, small_threshold=256, tile=None,
                          mxu_dtype=jnp.bfloat16, band=64):
    """weights: (T,) f32, x: (T, N) f32 -> scalar f32 loss (WeightOptimizer.forward)."""
    T, _ = x.shape
    if T <= small_threshold:
        return _small_loss(weights, x)        # exact f32, no grid overhead
    if tile is None:
        tile = _default_tile()
    return _tiled_loss(weights, x, tile=tile, mxu_dtype=mxu_dtype, band=band)


# ---------------------------------------------------------------------------
# references for validation
# ---------------------------------------------------------------------------
def _reference_loss_loop(weights, x):
    """Pure-JAX reference mirroring the PyTorch loop exactly."""
    T, _ = x.shape
    total = 0.0
    for k in range(1, T):
        dist = jnp.arange(k, 0, -1, dtype=jnp.float32)
        dw = 1.0 / (1.0 + jnp.exp(-0.7 * (31.0 - dist - 20.0)))
        kw = dw * weights[:k]
        x_pred = jnp.sum(kw[:, None] * x[:k], axis=0) / jnp.sum(kw)
        total = total + jnp.sum((x_pred - x[k]) ** 2)
    return total / (T - 1)


def _reference_loss_dense(weights, x):
    """Vectorized (dense W) reference; mathematically identical to the loop."""
    T, _ = x.shape
    k = jnp.arange(T, dtype=jnp.float32)[:, None]
    i = jnp.arange(T, dtype=jnp.float32)[None, :]
    dw = 1.0 / (1.0 + jnp.exp(-0.7 * (11.0 - (k - i))))
    W = jnp.where(i < k, dw * weights[None, :].astype(jnp.float32), 0.0)
    num = W @ x.astype(jnp.float32)
    denom = jnp.sum(W, axis=1, keepdims=True)
    pred = num / jnp.where(denom == 0.0, 1.0, denom)
    sq = jnp.sum((pred - x) ** 2, axis=1)
    return jnp.sum(sq[1:]) / (T - 1)


if __name__ == "__main__":
    key = jax.random.PRNGKey(0)
    kw1, kx1, kw2, kx2 = jax.random.split(key, 4)

    # 1) Small shape implied by the module (seq T=8, hidden N=32): exact path.
    T, N = 8, 32
    weights = jax.random.uniform(kw1, (T,), dtype=jnp.float32)   # torch.rand(T)
    x = jax.random.normal(kx1, (T, N), dtype=jnp.float32)
    loss_small = jax.block_until_ready(weight_optimizer_loss(weights, x))
    ref_small = _reference_loss_loop(weights, x)
    assert jnp.allclose(loss_small, ref_small, rtol=1e-5, atol=1e-5), (loss_small, ref_small)

    # 2) Larger shape exercising the banded tiled path (bf16 MXU, f32 acc).
    T2, N2 = 512, 40
    weights2 = jax.random.uniform(kw2, (T2,), dtype=jnp.float32)
    x2 = jax.random.normal(kx2, (T2, N2), dtype=jnp.float32)
    loss_big = jax.block_until_ready(weight_optimizer_loss(weights2, x2))
    ref_big = _reference_loss_dense(weights2, x2)
    assert jnp.allclose(loss_big, ref_big, rtol=2e-2, atol=1e-2), (loss_big, ref_big)

    print("KERNEL_OK")
</pallas_src>

<mosaic_0001>
module attributes {stable_mosaic.version = 11 : i64} {
  func.func @_small_kernel(%arg0: memref<1x8xf32, #tpu.memory_space<vmem>>, %arg1: memref<8x128xf32, #tpu.memory_space<vmem>>, %arg2: memref<1x128xf32, #tpu.memory_space<vmem>>) attributes {dimension_semantics = [], scalar_prefetch = 0 : i64, scratch_operands = 0 : i64, tpu.core_type = #tpu.core_type<tc>} {
    %c0 = arith.constant 0 : index
    %c0_0 = arith.constant 0 : index
    %0 = vector.load %arg1[%c0, %c0_0] : memref<8x128xf32, #tpu.memory_space<vmem>>, vector<8x128xf32>
    %c0_1 = arith.constant 0 : index
    %c0_2 = arith.constant 0 : index
    %1 = vector.load %arg0[%c0_1, %c0_2] : memref<1x8xf32, #tpu.memory_space<vmem>>, vector<1x8xf32>
    %2 = tpu.iota {dimensions = array<i32: 0>} : vector<8x8xi32>
    %3 = tpu.iota {dimensions = array<i32: 1>} : vector<8x8xi32>
    %4 = arith.subi %2, %3 : vector<8x8xi32>
    %5 = arith.sitofp %4 : vector<8x8xi32> to vector<8x8xf32>
    %cst = arith.constant 1.100000e+01 : f32
    %6 = vector.broadcast %cst : f32 to vector<8x8xf32>
    %7 = arith.subf %6, %5 : vector<8x8xf32>
    %cst_3 = arith.constant -0.699999988 : f32
    %8 = vector.broadcast %cst_3 : f32 to vector<8x8xf32>
    %9 = arith.mulf %8, %7 : vector<8x8xf32>
    %10 = math.exp %9 : vector<8x8xf32>
    %cst_4 = arith.constant 1.000000e+00 : f32
    %11 = vector.broadcast %cst_4 : f32 to vector<8x8xf32>
    %12 = arith.addf %11, %10 : vector<8x8xf32>
    %cst_5 = arith.constant 1.000000e+00 : f32
    %13 = vector.broadcast %cst_5 : f32 to vector<8x8xf32>
    %14 = arith.divf %13, %12 : vector<8x8xf32>
    %15 = arith.cmpi slt, %3, %2 : vector<8x8xi32>
    %16 = vector.broadcast %1 : vector<1x8xf32> to vector<8x8xf32>
    %17 = arith.mulf %14, %16 : vector<8x8xf32>
    %cst_6 = arith.constant 0.000000e+00 : f32
    %18 = vector.broadcast %cst_6 : f32 to vector<8x8xf32>
    %19 = arith.select %15, %17, %18 : vector<8x8xi1>, vector<8x8xf32>
    %cst_7 = arith.constant dense<0.000000e+00> : vector<8x128xf32>
    %20 = tpu.matmul %19, %0, %cst_7 {dimension_numbers = #tpu.dot_dimension_numbers<[1], [0], [0], [1], [0, 0, 1, 1], [], []>} : vector<8x8xf32>, vector<8x128xf32>, vector<8x128xf32> -> vector<8x128xf32>
    %21 = vector.extract_strided_slice %20 {offsets = [0, 32], sizes = [8, 1], strides = [1, 1]} : vector<8x128xf32> to vector<8x1xf32>
    %cst_8 = arith.constant 0.000000e+00 : f32
    %22 = vector.broadcast %cst_8 : f32 to vector<8x1xf32>
    %23 = arith.cmpf oeq, %21, %22 : vector<8x1xf32>
    %cst_9 = arith.constant 1.000000e+00 : f32
    %24 = vector.broadcast %cst_9 : f32 to vector<8x1xf32>
    %25 = arith.select %23, %24, %21 : vector<8x1xi1>, vector<8x1xf32>
    %26 = vector.broadcast %25 : vector<8x1xf32> to vector<8x128xf32>
    %27 = arith.divf %20, %26 : vector<8x128xf32>
    %28 = arith.subf %27, %0 : vector<8x128xf32>
    %29 = tpu.iota {dimensions = array<i32: 0>} : vector<8x1xi32>
    %c1_i32 = arith.constant 1 : i32
    %30 = vector.broadcast %c1_i32 : i32 to vector<8x1xi32>
    %31 = arith.cmpi sge, %29, %30 : vector<8x1xi32>
    %32 = arith.extui %31 : vector<8x1xi1> to vector<8x1xi32>
    %33 = arith.sitofp %32 : vector<8x1xi32> to vector<8x1xf32>
    %34 = arith.mulf %28, %28 : vector<8x128xf32>
    %cst_10 = arith.constant dense<0.000000e+00> : vector<8xf32>
    %35 = vector.multi_reduction <add>, %34, %cst_10 [1] : vector<8x128xf32> to vector<8xf32>
    %36 = vector.shape_cast %35 : vector<8xf32> to vector<8x1xf32>
    %37 = arith.mulf %36, %33 : vector<8x1xf32>
    %38 = vector.shape_cast %37 : vector<8x1xf32> to vector<1x8x1xf32>
    %cst_11 = arith.constant dense<0.000000e+00> : vector<1xf32>
    %39 = vector.multi_reduction <add>, %38, %cst_11 [1, 2] : vector<1x8x1xf32> to vector<1xf32>
    %40 = vector.shape_cast %39 : vector<1xf32> to vector<1x1x1xf32>
    %41 = vector.extract %40[0, 0, 0] : f32 from vector<1x1x1xf32>
    %cst_12 = arith.constant 7.000000e+00 : f32
    %42 = arith.divf %41, %cst_12 : f32
    %43 = vector.broadcast %42 : f32 to vector<1x128xf32>
    %c0_13 = arith.constant 0 : index
    %c0_14 = arith.constant 0 : index
    %44 = vector.load %arg2[%c0_13, %c0_14] : memref<1x128xf32, #tpu.memory_space<vmem>>, vector<1x128xf32>
    tpu.vector_store %arg2[%c0_13, %c0_14], %43 {strides = array<i32>} : memref<1x128xf32, #tpu.memory_space<vmem>>, vector<1x128xf32>,
    return
  }
}

</mosaic_0001>

<bundles_post_ra>
// kernel: tpu_custom_call.1
= control target key start
LH: loop header
LB: loop body
LE: loop exit
PB: predicated region body
PF: predicated region fallthrough
CT: control target
= control target key end

     0   :  { %7 = vsyncpa [#allocation3], 0  ;;  %s337_s0 = inlined_call_operand.hbm [shape: f32[1,8], index: 0, kind: input, shape index: {}]   ;;  %s338_s1 = inlined_call_operand.hbm [shape: f32[8,128], index: 1, kind: input, shape index: {}]   ;;  %s339_s2 = inlined_call_operand.hbm [shape: f32[1,128], index: 2, kind: output, shape index: {}]  }
   0x1   :  { %8 = vsyncpa [#allocation6], 0 }
   0x2   :  { %9 = vsyncpa [#allocation4], 0  ;;  %s280_s9 = smov [#allocation2]   ;;  %s281_s11 = smov [#allocation5]  }
   0x3   :  { %s16_s10 = sshll.u32 %s280_s9, 4  ;;  %s26_s12 = sshll.u32 %s281_s11, 4  ;;  %s17_s10 = int_to_ptr.vmem [resolvable:$true] %s16_s10  ;;  %s27_s12 = int_to_ptr.vmem [resolvable:$true] %s26_s12 }
   0x4   :  { %s208_s15 = scalar_lea.hbm %s337_s0, 16 }
   0x5   :  { %p209_p0 = scmp.ne.s32.totalorder %s337_s0, %s208_s15  ;;  %p212_p1 = scmp.lt.u32.totalorder %s208_s15, %s337_s0 }
   0x7   :  { %p214_p2 = pnand %p212_p1, %p209_p0 }
   0x9   :  { %217 = shalt.err (!%p214_p2)
}
   0xa   :  { %s218_s20 = scalar_lea.vmem %s17_s10, 16  ;;  %s222_s21 = scalar_lea.vmem %s17_s10, 32 }
   0xb   :  { %p219_p3 = scmp.ne.s32.totalorder %s17_s10, %s218_s20  ;;  %p223_p4 = scmp.lt.s32.totalorder %s17_s10, %s17_s10 }
   0xc   :  { %p224_p5 = scmp.lt.s32.totalorder %s222_s21, %s218_s20 }
   0xe   :  { %p225_p6 = por %p224_p5, %p223_p4 }
  0x10   :  { %p226_p7 = pnand %p225_p6, %p219_p3 }
  0x12   :  { %229 = shalt.err (!%p226_p7)
}
  0x13   :  { %19 = dma.hbm_to_vmem [thread:$0]  %s337_s0, 16, %s17_s10, [#allocation3]  }
  0x14   :  { %s230_s26 = scalar_lea.hbm %s338_s1, 128 }
  0x15   :  { %p231_p8 = scmp.ne.s32.totalorder %s338_s1, %s230_s26  ;;  %p234_p9 = scmp.lt.u32.totalorder %s230_s26, %s338_s1 }
  0x17   :  { %p236_p10 = pnand %p234_p9, %p231_p8 }
  0x19   :  { %239 = shalt.err (!%p236_p10)
}
  0x1a   :  { %s240_s3 = scalar_lea.vmem %s27_s12, 128  ;;  %p245_p12 = scmp.lt.s32.totalorder %s27_s12, %s27_s12 }
  0x1b   :  { %p241_p11 = scmp.ne.s32.totalorder %s27_s12, %s240_s3  ;;  %p246_p13 = scmp.lt.s32.totalorder %s240_s3, %s240_s3 }
  0x1d   :  { %p247_p0 = por %p246_p13, %p245_p12 }
  0x1f   :  { %p248_p1 = pnand %p247_p0, %p241_p11 }
  0x21   :  { %251 = shalt.err (!%p248_p1)
}
  0x22   :  { %29 = dma.hbm_to_vmem [thread:$0]  %s338_s1, 128, %s27_s12, [#allocation6]  }
  0x23   :  { %274 = dma.done.wait [#allocation3], 16  }
  0x24   :  { %275 = vsyncadd [#allocation3], 4294967280 }
  0x25   :  { %276 = dma.done.wait [#allocation6], 128  }
  0x26   :  { %277 = vsyncadd [#allocation6], 4294967168  ;;  %v38_v0 = vlaneseq  ;;  %v282_v1 = vmov 0.0   ;;  %vm283_vm0 = vmmov 0   ;;  %v36_v6 = vld [vmem:[#allocation5] sm:$0xff]  ;;  %vm60_vm2 = vcmask 64512  }
  0x27   :  { %188 = vmatprep.subr.mxu0 %v282_v1  ;;  %190 = vmatprep.mubr.msk.f32.mxu0 %vm283_vm0, %v282_v1  ;;  %v183_v12 = vld [vmem:[#allocation2] ss:$0 sm:$0xff]  ;;  %v284_v16 = vmov 32   ;;  %vm151_vm5 = vcmask 7168   ;;  %s285_s1 = smov [#allocation7]  }
  0x28   :  { %v39_v2 = vshrl.u32 %v38_v0, 7  ;;  %v41_v3 = vand.u32 127, %v38_v0  ;;  %189 = vmatpush3.msra.mxu0 %v36_v6  ;;  %201 = vset.pattern.permute.xlu0 %v284_v16  ;;  %s173_s5 = sshll.u32 %s285_s1, 4  ;;  %s174_s5 = int_to_ptr.vmem [resolvable:$true] %s173_s5 }
  0x29   :  { %s252_s8 = scalar_lea.vmem %s174_s5, 16  ;;  %s256_s9 = scalar_lea.vmem %s174_s5, 32 }
  0x2a   :  { %v42_v4 = vsub.s32 %v39_v2, %v41_v3  ;;  %vm51_vm1 = vcmp.lt.s32.totalorder %v41_v3, %v39_v2  ;;  %vm144_vm4 = vcmp.ge.s32.totalorder %v39_v2, 1  ;;  %p253_p2 = scmp.ne.s32.totalorder %s174_s5, %s252_s8  ;;  %p257_p3 = scmp.lt.s32.totalorder %s174_s5, %s174_s5 }
  0x2b   :  { %v185_v25 = vsel %vm144_vm4, 1.0, %v282_v1  ;;  %p258_p4 = scmp.lt.s32.totalorder %s256_s9, %s252_s8 }
  0x2c   :  { %v43_v5 = vcvt.s32.f32 %v42_v4 }
  0x2d   :  { %p259_p5 = por %p258_p4, %p257_p3 }
  0x2e   :  { %v44_v7 = vsub.f32 11.0, %v43_v5 }
  0x2f   :  { %p260_p6 = pnand %p259_p5, %p253_p2 }
  0x30   :  { %v45_v8 = vmul.f32 -0.7, %v44_v7 }
  0x32   :  { %v46_v9 = vmul.f32 1.442695, %v45_v8 }
  0x34   :  { %202 = vpow2.f32 %v46_v9 }
  0x3e   :  { %v203_v10 = vpop.eup %202 }
  0x3f   :  { %v48_v11 = vadd.f32 1.0, %v203_v10 }
  0x41   :  { %204 = vrcp.f32 %v48_v11 }
  0x4b   :  { %v205_v13 = vpop.eup %204 }
  0x4c   :  { %v58_v14 = vmul.f32 %v205_v13, %v183_v12 }
  0x4e   :  { %v59_v15 = vsel %vm51_vm1, %v58_v14, 0.0 }
  0x4f   :  { %191 = vmatmul.mubr.msk.f32.vlgmr.msra.gmra.mrb[0].mxu0 %vm60_vm2, %v59_v15 }
 0x122   :  { %v130_v17 = vpop.f32.mrb[0].mxu0 }
 0x123   :  { %v192_v18 = vpop.f32.mrb[1].mxu0  ;;  %vm134_vm3 = vcmp.eq.f32.partialorder %v130_v17, 0.0 }
 0x124   :  { %v135_v19 = vsel %vm134_vm3, 1.0, %v130_v17 }
 0x125   :  { %138 = vperm.xlu0 %201, %v135_v19  }
 0x1a4   :  { %v139_v20 = vpop.permute.xlu0 %138 }
 0x1a5   :  { %206 = vrcp.f32 %v139_v20 }
 0x1af   :  { %v207_v21 = vpop.eup %206 }
 0x1b0   :  { %v142_v22 = vmul.f32 %v207_v21, %v130_v17 }
 0x1b2   :  { %v143_v23 = vsub.f32 %v142_v22, %v36_v6 }
 0x1b4   :  { %v147_v24 = vmul.f32 %v143_v23, %v143_v23 }
 0x1b6   :  { %148 = vadd.xlane.f32.xlu0 %v147_v24 }
 0x243   :  { %v149_v26 = vpop.xlane.xlu0 %148 }
 0x244   :  { %v150_v27 = vmul.f32 %v185_v25, %v149_v26 }
 0x246   :  { %v152_v28 = vsel %vm151_vm5, %v150_v27, 0.0 }
 0x247   :  { %153 = vadd.xlane.f32.xlu1 %v152_v28 }
 0x2d4   :  { %v154_v29 = vpop.xlane.xlu1 %153 }
 0x2d5   :  { %v155_v30 = vrot.slane %v154_v29, 4 }
 0x2d7   :  { %v156_v31 = vadd.f32 %v155_v30, %v154_v29 }
 0x2d9   :  { %v157_v32 = vrot.slane %v156_v31, 2 }
 0x2db   :  { %v158_v33 = vadd.f32 %v157_v32, %v156_v31 }
 0x2dd   :  { %v159_v34 = vrot.slane %v158_v33, 1 }
 0x2df   :  { %v160_v35 = vadd.f32 %v159_v34, %v158_v33 }
 0x2e1   :  { %193 = vpush %v160_v35 }
 0x312   :  { %s194_s6 = spop %193 }
 0x313   :  { %s164_s7 = smul.f32 0.14285715, %s194_s6 }
 0x315   :  { %v165_v36 = vstv %s164_s7 }
 0x316   :  { %166 = vst [vmem:[#allocation7] sm:$0x1] %v165_v36 }
 0x317   :  { %263 = shalt.err (!%p260_p6)
}
 0x318   :  { %s264_s12 = scalar_lea.hbm %s339_s2, 16 }
 0x319   :  { %p265_p7 = scmp.ne.s32.totalorder %s339_s2, %s264_s12  ;;  %p268_p8 = scmp.lt.u32.totalorder %s264_s12, %s339_s2 }
 0x31b   :  { %p270_p9 = pnand %p268_p8, %p265_p7 }
 0x31d   :  { %273 = shalt.err (!%p270_p9)
}
 0x31e   :  { %176 = dma.vmem_to_hbm [thread:$0]  %s174_s5, 16, %s339_s2, [#allocation4]  }
 0x31f   :  { %278 = dma.done.wait [#allocation4], 16  }
 0x320   :  { %279 = vsyncadd [#allocation4], 4294967280 }
 0x321   :  { %180 = vsyncpa [#allocation3], 1 }
 0x322   :  { %181 = vsyncpa [#allocation6], 1 }
 0x323   :  { %182 = vsyncpa [#allocation4], 1 }

</bundles_post_ra>
